<compile_context>
chip_gen: v5e
topology: v5e:2x2
jax: 0.10.0
libtpu: 0.0.40
codegen_flags: <defaults>
</compile_context>

<pallas_src>
import functools

import jax
import jax.numpy as jnp
from jax.experimental import pallas as pl
from jax.experimental.pallas import tpu as pltpu

_LANE = 128
_TARGET_BLOCK_BYTES = 4 * 1024 * 1024  # ~4 MiB of input per grid step
_VMEM_LIMIT_BYTES = 32 * 1024 * 1024   # 2 bufs * (in + out) * 4 MiB = 16 MiB + headroom


def _sublane(dtype) -> int:
    """Native sublane packing: 8 for 32-bit, 16 for 16-bit, 32 for 8-bit dtypes."""
    return max(8, 32 // jnp.dtype(dtype).itemsize)


def _dropout_kernel(threshold_s32, seed_ref, x_ref, o_ref):
    """seed_ref: SMEM scalar-prefetch int32[1]; x_ref/o_ref: VMEM [tile_r, 128]."""
    shape = x_ref.shape

    # Per-tile seed (scalar unit, computed once): each grid step gets its own
    # stream, so the element counter only has to span one tile (no 2^32 wrap
    # for huge tensors) and tiles/cores are automatically decorrelated.
    i_u = pl.program_id(0).astype(jnp.uint32)
    seed_u = seed_ref[0].astype(jnp.uint32)
    tile_seed = (seed_u * jnp.uint32(0x9E3779B9)
                 + i_u * jnp.uint32(0x7FEB352D)
                 + jnp.uint32(1))

    # Local flat counter within the tile, then a short xorshift-multiply hash
    # (2 muls + 2 xorshifts) -- all plain 32-bit VPU integer ops.
    row = jax.lax.broadcasted_iota(jnp.uint32, shape, 0)
    col = jax.lax.broadcasted_iota(jnp.uint32, shape, 1)
    h = row * jnp.uint32(shape[1]) + col
    h = h ^ tile_seed
    h = h * jnp.uint32(0x9E3779B1)
    h = h ^ (h >> jnp.uint32(16))
    h = h * jnp.uint32(0x85EBCA6B)
    h = h ^ (h >> jnp.uint32(13))

    # keep  <=>  uniform(h) > p  <=>  h > round(p * 2^32)   (unsigned order).
    # Compare in signed order after flipping the sign bit (robust lowering);
    # the matching flip is pre-folded into `threshold_s32` on the host.
    h_s = jax.lax.bitcast_convert_type(h ^ jnp.uint32(0x80000000), jnp.int32)
    keep = h_s > jnp.int32(threshold_s32)

    x = x_ref[...]
    o_ref[...] = jnp.where(keep, x, jnp.zeros_like(x))


def _run_dropout_2d(x2d: jax.Array, p: float, seed: int) -> jax.Array:
    """Runs the kernel on a lane-dense [rows, 128] slab."""
    rows, lanes = x2d.shape
    assert lanes == _LANE
    itemsize = jnp.dtype(x2d.dtype).itemsize
    sub = _sublane(x2d.dtype)

    # Max rows per block that keeps ~4 MiB of input per grid step.
    max_rows = max(sub, _TARGET_BLOCK_BYTES // (_LANE * itemsize))

    # Force >=2 grid steps whenever possible so ("parallel",) shards the grid
    # across both v7x TensorCores; harmless on single-TC v5e/v6e.
    if rows <= sub:
        tile_r = rows
    else:
        half = -(-rows // 2)                 # ceil(rows / 2)
        half = -(-half // sub) * sub         # round up to sublane multiple
        tile_r = min(max_rows, half)
    grid = (pl.cdiv(rows, tile_r),)

    # Integer threshold: keep element iff hash > round(p * 2^32) (unsigned),
    # expressed as a signed compare after the sign-bit flip.
    t = int(round(float(p) * 2.0**32))
    t = max(0, min(t, 2**32 - 1))
    t_flipped = t ^ 0x80000000
    threshold_s32 = t_flipped - 2**32 if t_flipped >= 2**31 else t_flipped

    seed_arr = jnp.asarray([seed], dtype=jnp.int32)

    return pl.pallas_call(
        functools.partial(_dropout_kernel, threshold_s32),
        out_shape=jax.ShapeDtypeStruct((rows, _LANE), x2d.dtype),
        grid_spec=pltpu.PrefetchScalarGridSpec(
            num_scalar_prefetch=1,
            grid=grid,
            in_specs=[pl.BlockSpec((tile_r, _LANE), lambda i, seed: (i, 0))],
            out_specs=pl.BlockSpec((tile_r, _LANE), lambda i, seed: (i, 0)),
        ),
        compiler_params=pltpu.CompilerParams(
            dimension_semantics=("parallel",),
            vmem_limit_bytes=_VMEM_LIMIT_BYTES,
        ),
        cost_estimate=pl.CostEstimate(
            flops=rows * _LANE,
            transcendentals=0,
            bytes_accessed=2 * rows * _LANE * itemsize,
        ),
    )(seed_arr, x2d)


def dropout(x, p: float, seed: int = 0) -> jax.Array:
    """Dropout with drop-probability p, no rescaling (matches the reference)."""
    p = float(p)
    if not (0.0 <= p <= 1.0):
        raise ValueError("Probability 'p' must be a float between 0 and 1.")
    # TODO(synk): the reference's `isinstance(x, list)` TypeError is host-side
    # Python validation; here we accept any array-like and flatten it.

    x = jnp.asarray(x)
    orig_shape = x.shape
    n = x.size
    if n == 0:
        return x
    # Degenerate probabilities: skip the HBM pass + kernel launch entirely.
    if p == 0.0:
        return x
    if p == 1.0:
        return jnp.zeros_like(x)

    sub = _sublane(x.dtype)
    tile_elems = sub * _LANE
    flat = jnp.reshape(x, (-1,))

    if n % tile_elems == 0:
        # Fast path: no pad copy, no trailing slice copy (reshape only).
        out2d = _run_dropout_2d(flat.reshape(n // _LANE, _LANE), p, seed)
        return out2d.reshape(orig_shape)

    # Ragged tail: pad to a full (sublane, 128) tile and slice back.
    # TODO(synk): for very large unaligned tensors this costs extra HBM passes;
    # handling the tail in-kernel (scalar-prefetched length + masked store)
    # would avoid the padded copies.
    n_pad = pl.cdiv(n, tile_elems) * tile_elems
    x2d = jnp.pad(flat, (0, n_pad - n)).reshape(n_pad // _LANE, _LANE)
    out2d = _run_dropout_2d(x2d, p, seed)
    return out2d.reshape(-1)[:n].reshape(orig_shape)


if __name__ == "__main__":
    key = jax.random.PRNGKey(0)

    # "list of floats": 1-D vector, tile-aligned fast path (2 grid steps).
    n = 4096
    x = jax.random.normal(key, (n,), dtype=jnp.float32)
    p = 0.3
    y = jax.block_until_ready(dropout(x, p, seed=0))
    assert y.shape == x.shape
    # Every output element is either 0 or the unchanged input element.
    assert bool(jnp.all((y == x) | (y == 0)))
    zero_frac = float(jnp.mean((y == 0).astype(jnp.float32)))
    assert abs(zero_frac - p) < 0.1, f"zero fraction {zero_frac} far from p={p}"

    # Module-style tensor input (batch=2, channels=4, 16x16) = 2048 elems, aligned.
    x_img = jax.random.normal(jax.random.PRNGKey(2), (2, 4, 16, 16), dtype=jnp.float32)
    y_img = jax.block_until_ready(dropout(x_img, 0.5, seed=3))
    assert y_img.shape == x_img.shape
    assert bool(jnp.all((y_img == x_img) | (y_img == 0)))

    # Aligned size whose grid has a partial trailing block (rows=40, tile_r=24).
    x_mid = jax.random.normal(jax.random.PRNGKey(3), (40 * 128,), dtype=jnp.float32)
    y_mid = jax.block_until_ready(dropout(x_mid, 0.25, seed=11))
    assert y_mid.shape == x_mid.shape
    assert bool(jnp.all((y_mid == x_mid) | (y_mid == 0)))
    zf_mid = float(jnp.mean((y_mid == 0).astype(jnp.float32)))
    assert abs(zf_mid - 0.25) < 0.1, f"zero fraction {zf_mid} far from p=0.25"

    # Non-tile-aligned length exercises the padded path.
    x2 = jax.random.normal(jax.random.PRNGKey(1), (1000,), dtype=jnp.float32)
    y2 = jax.block_until_ready(dropout(x2, 0.5, seed=7))
    assert y2.shape == x2.shape
    assert bool(jnp.all((y2 == x2) | (y2 == 0)))

    # Degenerate probabilities skip the kernel.
    assert bool(jnp.all(dropout(x2, 0.0) == x2))
    assert bool(jnp.all(dropout(x2, 1.0) == 0))

    print("KERNEL_OK")
</pallas_src>

<mosaic_0001>
module attributes {stable_mosaic.version = 11 : i64} {
  func.func @_dropout_kernel(%arg0: i32, %arg1: memref<1xi32, #tpu.memory_space<smem>>, %arg2: memref<16x128xf32, #tpu.memory_space<vmem>>, %arg3: memref<16x128xf32, #tpu.memory_space<vmem>>) attributes {dimension_semantics = [#tpu.dimension_semantics<parallel>], iteration_bounds = array<i64: 2>, scalar_prefetch = 1 : i64, scratch_operands = 0 : i64, tpu.core_type = #tpu.core_type<tc>, window_params = [{transform_indices = @transform_0, window_bounds = array<i64: 16, 128>}, {transform_indices = @transform_1, window_bounds = array<i64: 16, 128>}]} {
    %c0 = arith.constant 0 : index
    %0 = memref.load %arg1[%c0] : memref<1xi32, #tpu.memory_space<smem>>
    %c-1640531527_i32 = arith.constant -1640531527 : i32
    %1 = arith.muli %0, %c-1640531527_i32 : i32
    %c2146121005_i32 = arith.constant 2146121005 : i32
    %2 = arith.muli %arg0, %c2146121005_i32 : i32
    %3 = arith.addi %1, %2 : i32
    %c1_i32 = arith.constant 1 : i32
    %4 = arith.addi %3, %c1_i32 : i32
    %5 = tpu.iota {dimensions = array<i32: 0>} : vector<16x128xi32>
    %6 = tpu.iota {dimensions = array<i32: 1>} : vector<16x128xi32>
    %c128_i32 = arith.constant 128 : i32
    %7 = vector.broadcast %c128_i32 : i32 to vector<16x128xi32>
    %8 = arith.muli %5, %7 : vector<16x128xi32>
    %9 = arith.addi %8, %6 : vector<16x128xi32>
    %10 = vector.broadcast %4 : i32 to vector<16x128xi32>
    %11 = arith.xori %9, %10 : vector<16x128xi32>
    %c-1640531535_i32 = arith.constant -1640531535 : i32
    %12 = vector.broadcast %c-1640531535_i32 : i32 to vector<16x128xi32>
    %13 = arith.muli %11, %12 : vector<16x128xi32>
    %c16_i32 = arith.constant 16 : i32
    %14 = vector.broadcast %c16_i32 : i32 to vector<16x128xi32>
    %15 = arith.shrui %13, %14 : vector<16x128xi32>
    %16 = arith.xori %13, %15 : vector<16x128xi32>
    %c-2048144789_i32 = arith.constant -2048144789 : i32
    %17 = vector.broadcast %c-2048144789_i32 : i32 to vector<16x128xi32>
    %18 = arith.muli %16, %17 : vector<16x128xi32>
    %c13_i32 = arith.constant 13 : i32
    %19 = vector.broadcast %c13_i32 : i32 to vector<16x128xi32>
    %20 = arith.shrui %18, %19 : vector<16x128xi32>
    %21 = arith.xori %18, %20 : vector<16x128xi32>
    %c-2147483648_i32 = arith.constant -2147483648 : i32
    %22 = vector.broadcast %c-2147483648_i32 : i32 to vector<16x128xi32>
    %23 = arith.xori %21, %22 : vector<16x128xi32>
    %24 = tpu.bitcast %23 : vector<16x128xi32> -> vector<16x128xi32>
    %c-858993459_i32 = arith.constant -858993459 : i32
    %25 = vector.broadcast %c-858993459_i32 : i32 to vector<16x128xi32>
    %26 = arith.cmpi sgt, %24, %25 : vector<16x128xi32>
    %c0_0 = arith.constant 0 : index
    %c0_1 = arith.constant 0 : index
    %27 = vector.load %arg2[%c0_0, %c0_1] : memref<16x128xf32, #tpu.memory_space<vmem>>, vector<16x128xf32>
    %cst = arith.constant 0.000000e+00 : f32
    %28 = vector.broadcast %cst : f32 to vector<16x128xf32>
    %29 = arith.select %26, %27, %28 : vector<16x128xi1>, vector<16x128xf32>
    %c0_2 = arith.constant 0 : index
    %c0_3 = arith.constant 0 : index
    %30 = vector.load %arg3[%c0_2, %c0_3] : memref<16x128xf32, #tpu.memory_space<vmem>>, vector<16x128xf32>
    tpu.vector_store %arg3[%c0_2, %c0_3], %29 {strides = array<i32>} : memref<16x128xf32, #tpu.memory_space<vmem>>, vector<16x128xf32>,
    return
  }
  func.func @transform_0(%arg0: i32, %arg1: memref<1xi32, #tpu.memory_space<smem>>) -> (i32, i32) {
    %c0_i32 = arith.constant 0 : i32
    %c0_i32_0 = arith.constant 0 : i32
    return %arg0, %c0_i32 : i32, i32
  }
  func.func @transform_1(%arg0: i32, %arg1: memref<1xi32, #tpu.memory_space<smem>>) -> (i32, i32) {
    %c0_i32 = arith.constant 0 : i32
    %c0_i32_0 = arith.constant 0 : i32
    return %arg0, %c0_i32 : i32, i32
  }
}

</mosaic_0001>

<bundles_post_ra>
// kernel: tpu_custom_call.1
= control target key start
LH: loop header
LB: loop body
LE: loop exit
PB: predicated region body
PF: predicated region fallthrough
CT: control target
= control target key end

     0   :  { %s591_s0 = inlined_call_operand.<no memory space> [shape: s32[1], index: 0, kind: input, shape index: {}]   ;;  %s592_s1 = inlined_call_operand.hbm [shape: f32[32,128], index: 1, kind: input, shape index: {}]   ;;  %s593_s2 = inlined_call_operand.hbm [shape: f32[32,128], index: 2, kind: output, shape index: {}]  }
   0x1   :  { %7 = sst [smem:[#allocation3]] %s591_s0 }
   0x2   :  { %8 = vsyncpa [#allocation5], 0 }
   0x3   :  { %10 = vsyncpa [#allocation5 + $0x1], 0 }
   0x4   :  { %11 = vsyncpa [#allocation6], 0 }
   0x5   :  { %13 = vsyncpa [#allocation6 + $0x1], 0  ;;  %s455_s11 = smov 0   ;;  %s457_s12 = smov 0  }
   0x6   :  { %s459_s13 = smov 0   ;;  %s461_s14 = smov 0  }
   0x7 LB: > { %s476_s0 = sadd.s32 4294967295, %s431_s14   ;;  %s269_s15 = sadd.s32 4294967294, %s431_s14   ;;  %s431_s14 = sphi %s461_s14, %s603_s14   ;;  %s427_s13 = sphi %s459_s13, %s602_s13   ;;  %s423_s12 = sphi %s457_s12, %s601_s12   ;;  %s419_s11 = sphi %s455_s11, %s600_s11  }
   0x8   : > { %s480_s16 = sadd.s32 1, %s431_s14   ;;  %s26_s17 = sadd.s32 1, %s427_s13 }
   0x9   : > { %s23_s18 = ssub.s32 %s431_s14, %s480_s16  ;;  %p33_p0 = scmp.ne.s32.totalorder %s427_s13, %s423_s12 }
   0xa   : > { %p24_p1 = scmp.eq.s32.totalorder %s23_s18, 0  ;;  %p34_p2 = scmp.eq.s32.totalorder %s431_s14, 0 }
   0xb   : > { %p39_p3 = scmp.ne.s32.totalorder %s423_s12, %s419_s11  ;;  %p40_p4 = scmp.eq.s32.totalorder %s476_s0, 0 }
   0xc   : > { %s492_s19 = scalar_select %p24_p1, %s427_s13, %s26_s17  }
   0xd   : > { %p494_p5 = por %p34_p2, %p33_p0  ;;  %p498_p6 = por %p40_p4, %p39_p3 }
   0xe   : > { %p63_p7 = scmp.eq.s32.totalorder %s476_s0, 1  ;;  %p69_p8 = scmp.eq.s32.totalorder %s269_s15, 1 }
   0xf   : > { %p297_p10 = scmp.lt.s32.totalorder %s431_s14, 2  ;;  %s89_s24 = sand.u32 1, %s427_s13  }
  0x10   : > { %p505_p11 = por %p63_p7, %p33_p0  ;;  %p509_p12 = por %p69_p8, %p39_p3 }
  0x11   : > { %s283_s25 = sshll.u32 %s431_s14, 4  ;;  %s272_s26 = sshll.u32 %s89_s24, 4 }
  0x12   : > { %s98_s29 = scalar_lea.hbm %s592_s1, %s283_s25  ;;  %s93_s3 = scalar_lea.vmem [#allocation4], %s272_s26 }
  0x13   : > { %s99_s30 = sshll.u32 %s98_s29, 4  ;;  %s101_s4 = sshll.u32 %s93_s3, 4  ;;  %s100_s30 = int_to_ptr.hbm [resolvable:$true] %s99_s30  ;;  %s102_s4 = int_to_ptr.vmem [resolvable:$true] %s101_s4 }
  0x14   : > { %p520_p13 = pnand %p297_p10, %p494_p5  ;;  %p275_p0 = scmp.ge.s32.totalorder %s431_s14, 1 }
  0x15   : > { %p109_p1 = scmp.lt.s32.totalorder %s431_s14, 3  ;;  %s90_s6 = scalar_lea.sflag [#allocation5], %s89_s24 }
  0x16   : > { %s335_s7 = sshra.s32 %s100_s30, 4  ;;  %p339_p3 = pneg %p520_p13  ;;  %s336_s7 = int_to_ptr.hbm [resolvable:$true] %s335_s7 }
  0x17   : > { %s337_s8 = scalar_lea.hbm %s336_s7, 16  ;;  %s342_s15 = scalar_lea.hbm %s592_s1, 32 }
  0x18   : > { %p338_p2 = scmp.ne.s32.totalorder %s336_s7, %s337_s8  ;;  %p343_p5 = scmp.lt.s32.totalorder %s336_s7, %s592_s1 }
  0x19   : > { %p344_p8 = scmp.lt.s32.totalorder %s342_s15, %s337_s8 }
  0x1a   : > { %p340_p4 = pnand %p339_p3, %p338_p2 }
  0x1b   : > { %p345_p10 = por %p344_p8, %p343_p5 }
  0x1c   : > { %p341_p7 = pneg %p340_p4 }
  0x1e   : > { %p346_p9 = pnand %p345_p10, %p341_p7 }
  0x20   : > { %349 = shalt.err (!%p346_p9)
}
  0x21   : > { %s433_s20 = smov 128   ;;  %s434_s24 = smov 8  }
  0x22   : > { %292 = dma.hbm_to_vmem [thread:$0]  (!%p520_p13), %s100_s30, 256, %s102_s4, %s90_s6, %s433_s20, %s433_s20, %s434_s24  }
  0x23   : > { %p110_p2 = pnand %p275_p0, %p109_p1 }
  0x24   : > { %s541_s25 = sand.u32 (!%p110_p2), 1, %s423_s12  }
  0x25   : > { %113 = sbr.rel (%p110_p2) target bundleno = 77 (0x4d), region = 24  ;;  %s276_s26 = sshll.u32 (!%p110_p2), %s541_s25, 4 }
  0x26   : > { %s116_s27 = scalar_lea.sflag (!%p110_p2), [#allocation5], %s541_s25  ;;  %s547_s28 = scalar_lea.vmem (!%p110_p2), [#allocation4], %s276_s26 }
  0x2a   : > { %410 = dma.done.wait (%p498_p6), %s116_s27, 256  }
  0x2b   : > { %412 = vsyncadd (%p498_p6), %s116_s27, 4294967040  ;;  %v146_v0 = vlaneseq  ;;  %s141_s29 = sld [smem:[#allocation3]]  ;;  %s143_s30 = smul.u32 2146121005, %s476_s0  ;;  %v174_v24 = vld [vmem:[%s547_s28] sm:$0xff]  ;;  %v175_v26 = vld [vmem:[%s547_s28 + $0x8] sm:$0xff] }
  0x2c   : > { %s284_s21 = sshll.u32 %s476_s0, 4  ;;  %s138_s9 = scalar_lea.vmem [#allocation7], %s276_s26 }
  0x2d   : > { %v147_v1 = vshrl.u32 %v146_v0, 7  ;;  %v150_v2 = vand.u32 127, %v146_v0  ;;  %s192_s8 = scalar_lea.hbm %s593_s2, %s284_s21  ;;  %s193_s10 = sshll.u32 %s138_s9, 4  ;;  %s194_s10 = int_to_ptr.vmem [resolvable:$true] %s193_s10 }
  0x2e   : > { %s195_s15 = sshll.u32 %s192_s8, 4  ;;  %s181_s0 = scalar_lea.sflag [#allocation6], %s541_s25  ;;  %s196_s15 = int_to_ptr.hbm [resolvable:$true] %s195_s15 }
  0x2f   : > { %v151_v3 = vmul.u32 128, %v147_v1  ;;  %v148_v4 = vadd.s32 8, %v147_v1  ;;  %s379_s17 = sshra.s32 %s196_s15, 4  ;;  %s385_s26 = scalar_lea.hbm %s593_s2, 32  ;;  %s380_s17 = int_to_ptr.hbm [resolvable:$true] %s379_s17 }
  0x30   : > { %s381_s18 = scalar_lea.hbm %s380_s17, 16  ;;  %p386_p0 = scmp.lt.s32.totalorder %s380_s17, %s593_s2 }
  0x31   : > { %v152_v5 = vmul.u32 128, %v148_v4  ;;  %s142_s3 = smul.u32 2654435769, %s141_s29  ;;  %v153_v6 = vadd.s32 %v151_v3, %v150_v2  ;;  %p382_p6 = scmp.ne.s32.totalorder %s380_s17, %s381_s18 }
  0x32   : > { %p387_p1 = scmp.lt.s32.totalorder %s385_s26, %s381_s18 }
  0x33   : > { %v154_v7 = vadd.s32 %v152_v5, %v150_v2  ;;  %s144_s4 = sadd.s32 %s143_s30, %s142_s3  ;;  %p383_p9 = pnand %p382_p6, %p505_p11 }
  0x34   : > { %s145_s5 = sadd.s32 1, %s144_s4  ;;  %p388_p3 = por %p387_p1, %p386_p0 }
  0x35   : > { %v155_v8 = vstv %s145_s5  ;;  %p384_p13 = pneg %p383_p9 }
  0x36   : > { %v156_v9 = vxor.u32 %v155_v8, %v153_v6  ;;  %v157_v10 = vxor.u32 %v155_v8, %v154_v7 }
  0x37   : > { %p389_p4 = pnand %p388_p3, %p384_p13 }
  0x38   : > { %v158_v11 = vmul.u32 2654435761, %v156_v9  ;;  %v159_v12 = vmul.u32 2654435761, %v157_v10 }
  0x3a   : > { %v160_v13 = vshrl.u32 %v158_v11, 16  ;;  %v161_v14 = vshrl.u32 %v159_v12, 16 }
  0x3c   : > { %v162_v15 = vxor.u32 %v160_v13, %v158_v11  ;;  %v163_v16 = vxor.u32 %v161_v14, %v159_v12 }
  0x3e   : > { %v164_v17 = vmul.u32 2246822507, %v162_v15  ;;  %v165_v18 = vmul.u32 2246822507, %v163_v16 }
  0x40   : > { %v166_v19 = vshrl.u32 %v164_v17, 13  ;;  %v167_v20 = vshrl.u32 %v165_v18, 13 }
  0x42   : > { %v168_v21 = vxor.u32 %v166_v19, %v164_v17  ;;  %v169_v22 = vxor.u32 %v167_v20, %v165_v18 }
  0x44   : > { %v170_v23 = vxor.u32 2147483648, %v168_v21  ;;  %v171_v25 = vxor.u32 2147483648, %v169_v22 }
  0x46   : > { %vm172_vm0 = vcmp.gt.s32.totalorder %v170_v23, 3435973837  ;;  %vm173_vm1 = vcmp.gt.s32.totalorder %v171_v25, 3435973837 }
  0x47   : > { %v176_v27 = vsel %vm172_vm0, %v174_v24, 0.0  ;;  %v177_v28 = vsel %vm173_vm1, %v175_v26, 0.0 }
  0x48   : > { %178 = vst [vmem:[%s138_s9] sm:$0xff] %v176_v27 }
  0x49   : > { %179 = vst [vmem:[%s138_s9 + $0x8] sm:$0xff] %v177_v28 }
  0x4a   : > { %392 = shalt.err (!%p389_p4)
}
  0x4b   : > { %s435_s25 = smov 128   ;;  %s436_s29 = smov 8  }
  0x4c   : > { %287 = dma.vmem_to_hbm [thread:$0]  (%p505_p11), %s194_s10, 256, %s196_s15, %s181_s0, %s435_s25, %s435_s25, %s436_s29  }
  0x4d PF: > { %s210_s30 = sand.u32 1, %s419_s11   ;;  %p599_p7 = scmp.ge.s32.totalorder %s431_s14, 2 }
  0x4e   : > { %s211_s3 = scalar_lea.sflag [#allocation6], %s210_s30 }
  0x4f   : > { %p294_p5 = pnand %p599_p7, %p509_p12 }
  0x51   : > { %p295_p8 = pneg %p294_p5 }
  0x53   : > { %414 = dma.done.wait (%p295_p8), %s211_s3, 256  }
  0x54   : > { %416 = vsyncadd (%p295_p8), %s211_s3, 4294967040  ;;  %p16_p10 = scmp.ge.s32.totalorder %s480_s16, 4   ;;  %s600_s11 = smov %s423_s12 }
  0x55   : > { %s601_s12 = smov %s427_s13  ;;  %s602_s13 = smov %s492_s19 }
  0x56   : > { %s603_s14 = smov %s480_s16  ;;  %18 = sbr.rel (!%p16_p10) target bundleno = 7 (0x7), region = 69 }
  0x5b   :  { %217 = vsyncpa [#allocation5], 1 }
  0x5c   :  { %219 = vsyncpa [#allocation5 + $0x1], 1 }
  0x5d   :  { %220 = vsyncpa [#allocation6], 1 }
  0x5e   :  { %222 = vsyncpa [#allocation6 + $0x1], 1 }

</bundles_post_ra>
